<compile_context>
chip_gen: v5e
topology: v5e:2x2
jax: 0.10.0
libtpu: 0.0.40
codegen_flags: <defaults>
</compile_context>

<pallas_src>
import functools

import jax
import jax.numpy as jnp
from jax.experimental import pallas as pl
from jax.experimental.pallas import tpu as pltpu


def _yolo_kernel(x_ref, grid_ref, wh_ref, io_ref, *, stride, nc, B):
    # x_ref:    (R, s_tile)   raw predictions, channel-major rows (R = C*B)
    # grid_ref: (2B, s_tile)  stride-scaled grid x (rows 0:B) / y (rows B:2B)
    # wh_ref:   (2B, s_tile)  anchor w (rows 0:B) / h (rows B:2B), pixel units
    B2 = 2 * B
    B4 = 4 * B
    R, s_tile = io_ref.shape

    # xy: io = sigmoid(x)*stride + grid*stride   (stride already folded in grid_ref)
    io_ref[0:B2, :] = jax.nn.sigmoid(x_ref[0:B2, :]) * stride + grid_ref[...]

    # wh: io = exp(x) * (anchor_vec * stride) == exp(x) * anchors
    io_ref[B2:B4, :] = jnp.exp(x_ref[B2:B4, :]) * wh_ref[...]

    # objectness + class scores: plain sigmoid
    io_ref[B4:R, :] = jax.nn.sigmoid(x_ref[B4:R, :])

    if nc == 1:
        # single-class special case: io[..., 5] = 1 (rows of channel 5)
        io_ref[5 * B:6 * B, :] = jnp.ones((B, s_tile), io_ref.dtype)


def _pick_s_tile(S):
    # One lane-dense block unless the spatial dim is large; a multi-tile
    # "parallel" spatial grid also lets v7x shard across its two TensorCores.
    if S <= 4096 or S % 128 != 0:
        return S
    for t in (4096, 2048, 1024, 512, 256, 128):
        if S % t == 0:
            return t
    return S


def yolo_layer_forward(p, anchors, nc, img_size):
    """Inference-mode YOLOLayer.forward.

    p:       (bs, na*(nc+5), ny, nx) float32  (NCHW, as in PyTorch)
    anchors: (na, 2) float32
    Returns (io, p_perm) matching the PyTorch module:
      io:     (bs, na*ny*nx, nc+5)
      p_perm: (bs, na, ny, nx, nc+5)
    """
    bs, _, ny, nx = p.shape
    na = anchors.shape[0]
    C = nc + 5
    S = ny * nx
    B = bs * na
    R = C * B
    stride = float(img_size) / float(max(ny, nx))

    # PyTorch: p.view(bs, na, C, ny, nx).permute(0,1,3,4,2)
    p5 = p.reshape(bs, na, C, ny, nx)
    p_perm = jnp.transpose(p5, (0, 1, 3, 4, 2))             # (bs, na, ny, nx, C)

    # kernel-layout input: channel-major rows, lane-dense spatial columns
    x_kern = jnp.transpose(p5.reshape(bs, na, C, S), (2, 0, 1, 3)).reshape(R, S)

    # stride-scaled grid additive for the xy channel rows
    yv, xv = jnp.meshgrid(jnp.arange(ny), jnp.arange(nx), indexing="ij")
    gx = xv.reshape(-1).astype(jnp.float32) * stride          # (S,)
    gy = yv.reshape(-1).astype(jnp.float32) * stride
    grid_add = jnp.concatenate(
        [jnp.broadcast_to(gx, (B, S)), jnp.broadcast_to(gy, (B, S))], axis=0
    )                                                         # (2B, S)

    # wh multiplier: anchor_wh * stride == anchors (pixel units), per (b, a) row
    anchors = anchors.astype(jnp.float32)
    aw = jnp.broadcast_to(anchors[:, 0][None, :, None], (bs, na, S)).reshape(B, S)
    ah = jnp.broadcast_to(anchors[:, 1][None, :, None], (bs, na, S)).reshape(B, S)
    wh_mul = jnp.concatenate([aw, ah], axis=0)                # (2B, S)

    s_tile = _pick_s_tile(S)
    kernel = functools.partial(_yolo_kernel, stride=stride, nc=nc, B=B)

    io_kern = pl.pallas_call(
        kernel,
        out_shape=jax.ShapeDtypeStruct((R, S), jnp.float32),
        grid=(S // s_tile,),
        in_specs=[
            pl.BlockSpec((R, s_tile), lambda i: (0, i)),
            pl.BlockSpec((2 * B, s_tile), lambda i: (0, i)),
            pl.BlockSpec((2 * B, s_tile), lambda i: (0, i)),
        ],
        out_specs=pl.BlockSpec((R, s_tile), lambda i: (0, i)),
        compiler_params=pltpu.CompilerParams(
            dimension_semantics=("parallel",)),
    )(x_kern, grid_add, wh_mul)

    # back to PyTorch layout: (C, bs, na, ny, nx) -> (bs, na, ny, nx, C) -> view
    io = jnp.transpose(io_kern.reshape(C, bs, na, ny, nx),
                       (1, 2, 3, 4, 0)).reshape(bs, na * ny * nx, C)
    return io, p_perm


def _reference_forward(p, anchors, nc, img_size):
    """Pure-JAX reference mirroring the PyTorch code path (eval mode)."""
    bs, _, ny, nx = p.shape
    na = anchors.shape[0]
    C = nc + 5
    stride = float(img_size) / float(max(ny, nx))
    yv, xv = jnp.meshgrid(jnp.arange(ny), jnp.arange(nx), indexing="ij")
    grid_xy = jnp.stack((xv, yv), 2).astype(jnp.float32).reshape(1, 1, ny, nx, 2)
    anchor_wh = (anchors.astype(jnp.float32) / stride).reshape(1, na, 1, 1, 2)

    pp = jnp.transpose(p.reshape(bs, na, C, ny, nx), (0, 1, 3, 4, 2))
    io = pp
    io = io.at[..., 0:2].set(jax.nn.sigmoid(io[..., 0:2]) + grid_xy)
    io = io.at[..., 2:4].set(jnp.exp(io[..., 2:4]) * anchor_wh)
    io = io.at[..., 4:].set(jax.nn.sigmoid(io[..., 4:]))
    io = io.at[..., :4].set(io[..., :4] * stride)
    if nc == 1:
        io = io.at[..., 5].set(1.0)
    return io.reshape(bs, -1, C), pp


if __name__ == "__main__":
    # Small, module-consistent shapes: bs=2, na=3 anchors, nc=4 classes,
    # 16x16 feature map -> input channels = na*(nc+5) = 27.
    key = jax.random.PRNGKey(0)
    bs, na, nc, ny, nx = 2, 3, 4, 16, 16
    img_size = 256  # stride = 256 / 16 = 16

    anchors = jnp.array([[10.0, 13.0], [16.0, 30.0], [33.0, 23.0]],
                        dtype=jnp.float32)
    p = jax.random.normal(key, (bs, na * (nc + 5), ny, nx), dtype=jnp.float32)

    io, p_perm = yolo_layer_forward(p, anchors, nc, img_size)
    io = jax.block_until_ready(io)
    p_perm = jax.block_until_ready(p_perm)

    io_ref, p_ref = _reference_forward(p, anchors, nc, img_size)
    assert io.shape == (bs, na * ny * nx, nc + 5)
    assert p_perm.shape == (bs, na, ny, nx, nc + 5)
    assert jnp.allclose(io, io_ref, atol=1e-5, rtol=1e-5)
    assert jnp.allclose(p_perm, p_ref, atol=1e-6, rtol=1e-6)

    # single-class path exercises the io[..., 5] = 1 branch
    nc1 = 1
    p1 = jax.random.normal(jax.random.PRNGKey(1),
                           (bs, na * (nc1 + 5), ny, nx), dtype=jnp.float32)
    io1, _ = yolo_layer_forward(p1, anchors, nc1, img_size)
    io1 = jax.block_until_ready(io1)
    io1_ref, _ = _reference_forward(p1, anchors, nc1, img_size)
    assert jnp.allclose(io1, io1_ref, atol=1e-5, rtol=1e-5)

    print("KERNEL_OK")
</pallas_src>

<mosaic_0001>
module attributes {stable_mosaic.version = 11 : i64} {
  func.func @_yolo_kernel(%arg0: i32, %arg1: memref<54x256xf32, #tpu.memory_space<vmem>>, %arg2: memref<12x256xf32, #tpu.memory_space<vmem>>, %arg3: memref<12x256xf32, #tpu.memory_space<vmem>>, %arg4: memref<54x256xf32, #tpu.memory_space<vmem>>) attributes {dimension_semantics = [#tpu.dimension_semantics<parallel>], iteration_bounds = array<i64: 1>, scalar_prefetch = 0 : i64, scratch_operands = 0 : i64, tpu.core_type = #tpu.core_type<tc>, window_params = [{transform_indices = @transform_0, window_bounds = array<i64: 54, 256>}, {transform_indices = @transform_1, window_bounds = array<i64: 12, 256>}, {transform_indices = @transform_2, window_bounds = array<i64: 12, 256>}, {transform_indices = @transform_3, window_bounds = array<i64: 54, 256>}]} {
    %c0 = arith.constant 0 : index
    %c0_0 = arith.constant 0 : index
    %0 = vector.load %arg1[%c0, %c0_0] : memref<54x256xf32, #tpu.memory_space<vmem>>, vector<12x256xf32>
    %1 = arith.negf %0 : vector<12x256xf32>
    %2 = math.exp %1 : vector<12x256xf32>
    %cst = arith.constant 1.000000e+00 : f32
    %3 = vector.broadcast %cst : f32 to vector<12x256xf32>
    %4 = arith.addf %3, %2 : vector<12x256xf32>
    %5 = arith.divf %3, %4 : vector<12x256xf32>
    %cst_1 = arith.constant 1.600000e+01 : f32
    %6 = vector.broadcast %cst_1 : f32 to vector<12x256xf32>
    %7 = arith.mulf %5, %6 : vector<12x256xf32>
    %c0_2 = arith.constant 0 : index
    %c0_3 = arith.constant 0 : index
    %8 = vector.load %arg2[%c0_2, %c0_3] : memref<12x256xf32, #tpu.memory_space<vmem>>, vector<12x256xf32>
    %9 = arith.addf %7, %8 : vector<12x256xf32>
    %c0_4 = arith.constant 0 : index
    %c0_5 = arith.constant 0 : index
    %10 = vector.load %arg4[%c0_4, %c0_5] : memref<54x256xf32, #tpu.memory_space<vmem>>, vector<12x256xf32>
    tpu.vector_store %arg4[%c0_4, %c0_5], %9 {strides = array<i32>} : memref<54x256xf32, #tpu.memory_space<vmem>>, vector<12x256xf32>,
    %c12 = arith.constant 12 : index
    %c0_6 = arith.constant 0 : index
    %11 = vector.load %arg1[%c12, %c0_6] : memref<54x256xf32, #tpu.memory_space<vmem>>, vector<12x256xf32>
    %12 = math.exp %11 : vector<12x256xf32>
    %c0_7 = arith.constant 0 : index
    %c0_8 = arith.constant 0 : index
    %13 = vector.load %arg3[%c0_7, %c0_8] : memref<12x256xf32, #tpu.memory_space<vmem>>, vector<12x256xf32>
    %14 = arith.mulf %12, %13 : vector<12x256xf32>
    %c12_9 = arith.constant 12 : index
    %c0_10 = arith.constant 0 : index
    %15 = vector.load %arg4[%c12_9, %c0_10] : memref<54x256xf32, #tpu.memory_space<vmem>>, vector<12x256xf32>
    tpu.vector_store %arg4[%c12_9, %c0_10], %14 {strides = array<i32>} : memref<54x256xf32, #tpu.memory_space<vmem>>, vector<12x256xf32>,
    %c24 = arith.constant 24 : index
    %c0_11 = arith.constant 0 : index
    %16 = vector.load %arg1[%c24, %c0_11] : memref<54x256xf32, #tpu.memory_space<vmem>>, vector<30x256xf32>
    %17 = arith.negf %16 : vector<30x256xf32>
    %18 = math.exp %17 : vector<30x256xf32>
    %cst_12 = arith.constant 1.000000e+00 : f32
    %19 = vector.broadcast %cst_12 : f32 to vector<30x256xf32>
    %20 = arith.addf %19, %18 : vector<30x256xf32>
    %21 = arith.divf %19, %20 : vector<30x256xf32>
    %c24_13 = arith.constant 24 : index
    %c0_14 = arith.constant 0 : index
    %22 = vector.load %arg4[%c24_13, %c0_14] : memref<54x256xf32, #tpu.memory_space<vmem>>, vector<30x256xf32>
    tpu.vector_store %arg4[%c24_13, %c0_14], %21 {strides = array<i32>} : memref<54x256xf32, #tpu.memory_space<vmem>>, vector<30x256xf32>,
    return
  }
  func.func @transform_0(%arg0: i32) -> (i32, i32) {
    %c0_i32 = arith.constant 0 : i32
    %c0_i32_0 = arith.constant 0 : i32
    return %c0_i32, %arg0 : i32, i32
  }
  func.func @transform_1(%arg0: i32) -> (i32, i32) {
    %c0_i32 = arith.constant 0 : i32
    %c0_i32_0 = arith.constant 0 : i32
    return %c0_i32, %arg0 : i32, i32
  }
  func.func @transform_2(%arg0: i32) -> (i32, i32) {
    %c0_i32 = arith.constant 0 : i32
    %c0_i32_0 = arith.constant 0 : i32
    return %c0_i32, %arg0 : i32, i32
  }
  func.func @transform_3(%arg0: i32) -> (i32, i32) {
    %c0_i32 = arith.constant 0 : i32
    %c0_i32_0 = arith.constant 0 : i32
    return %c0_i32, %arg0 : i32, i32
  }
}

</mosaic_0001>

<bundles_post_ra>
// kernel: tpu_custom_call.1
= control target key start
LH: loop header
LB: loop body
LE: loop exit
PB: predicated region body
PF: predicated region fallthrough
CT: control target
= control target key end

     0   :  { %8 = vsyncpa [#allocation3], 0  ;;  %s805_s0 = inlined_call_operand.hbm [shape: f32[54,256], index: 0, kind: input, shape index: {}]   ;;  %s806_s1 = inlined_call_operand.hbm [shape: f32[12,256], index: 1, kind: input, shape index: {}]   ;;  %s807_s2 = inlined_call_operand.hbm [shape: f32[12,256], index: 2, kind: input, shape index: {}]   ;;  %s808_s3 = inlined_call_operand.hbm [shape: f32[54,256], index: 3, kind: output, shape index: {}]  }
   0x1   :  { %9 = vsyncpa [#allocation6], 0 }
   0x2   :  { %10 = vsyncpa [#allocation4], 0  ;;  %s28_s14 = sshll.u32 %s806_s1, 4  ;;  %s561_s15 = smov [#allocation5]   ;;  %s29_s14 = int_to_ptr.hbm [resolvable:$true] %s28_s14 }
   0x3   :  { %s30_s16 = sshll.u32 %s561_s15, 4  ;;  %s15_s19 = sshll.u32 %s805_s0, 4  ;;  %s31_s16 = int_to_ptr.vmem [resolvable:$true] %s30_s16  ;;  %s16_s19 = int_to_ptr.hbm [resolvable:$true] %s15_s19 }
   0x4   :  { %s562_s20 = smov 256   ;;  %s563_s21 = smov 16  }
   0x5   :  { %36 = dma.hbm_to_vmem [thread:$0]  %s29_s14, 512, %s31_s16, [#allocation6], %s562_s20, %s562_s20, %s563_s21  }
   0x6   :  { %s564_s22 = smov [#allocation2]   ;;  %s41_s1 = sshll.u32 %s807_s2, 4  ;;  %s42_s1 = int_to_ptr.hbm [resolvable:$true] %s41_s1 }
   0x7   :  { %s17_s23 = sshll.u32 %s564_s22, 4  ;;  %s565_s0 = smov [#allocation7]   ;;  %s18_s23 = int_to_ptr.vmem [resolvable:$true] %s17_s23 }
   0x8   :  { %23 = dma.hbm_to_vmem [thread:$0]  %s16_s19, 1792, %s18_s23, [#allocation3], %s562_s20, %s562_s20, %s563_s21  }
   0x9   :  { %s43_s26 = sshll.u32 %s565_s0, 4  ;;  %s44_s26 = int_to_ptr.vmem [resolvable:$true] %s43_s26 }
   0xa   :  { %49 = dma.hbm_to_vmem [thread:$0]  %s42_s1, 512, %s44_s26, [#allocation6], %s562_s20, %s562_s20, %s563_s21  }
   0xb   :  { %555 = dma.done.wait [#allocation3], 1792  }
   0xc   :  { %556 = vsyncadd [#allocation3], 4294965504 }
   0xd   :  { %557 = dma.done.wait [#allocation6], 1024  }
   0xe   :  { %558 = vsyncadd [#allocation6], 4294966272  ;;  %v62_v0 = vld [vmem:[#allocation2] sm:$0xff]  ;;  %v63_v1 = vld [vmem:[#allocation2 + $0x8] sm:$0xff]  ;;  %vm178_vm0 = vcmask 1043456   ;;  %s566_s2 = smov [#allocation8]  }
   0xf   :  { %v385_v2 = vmul.f32 -1.442695, %v62_v0  ;;  %v386_v3 = vmul.f32 -1.442695, %v63_v1  ;;  %v64_v4 = vld [vmem:[#allocation2 + $0x10] sm:$0xf] }
  0x10   :  { %v65_v5 = vld [vmem:[#allocation2 + $0x18] sm:$0xf]  ;;  %v387_v6 = vmul.f32 -1.442695, %v64_v4  ;;  %v158_v8 = vld [vmem:[#allocation2 + $0x10] sm:$0xf0] }
  0x11   :  { %403 = vpow2.f32 %v385_v2  ;;  %v388_v7 = vmul.f32 -1.442695, %v65_v5  ;;  %v159_v9 = vld [vmem:[#allocation2 + $0x18] sm:$0xf0]  ;;  %v162_v10 = vmul.f32 1.442695, %v158_v8 }
  0x12   :  { %405 = vpow2.f32 %v386_v3  ;;  %v170_v11 = vld [vmem:[#allocation7] sm:$0xff]  ;;  %v164_v12 = vmul.f32 1.442695, %v159_v9  ;;  %v160_v13 = vld [vmem:[#allocation2 + $0x20] sm:$0xff]  ;;  %v171_v14 = vld [vmem:[#allocation7 + $0x8] sm:$0xff]  ;;  %s369_s27 = sshll.u32 %s566_s2, 4  ;;  %s370_s27 = int_to_ptr.vmem [resolvable:$true] %s369_s27 }
  0x13   :  { %407 = vpow2.f32 %v387_v6  ;;  %v166_v15 = vmul.f32 1.442695, %v160_v13  ;;  %v172_v16 = vld [vmem:[#allocation7 + $0x10] sm:$0xf]  ;;  %v161_v17 = vld [vmem:[#allocation2 + $0x28] sm:$0xff]  ;;  %v197_v20 = vld [vmem:[#allocation2 + $0x30] sm:$0xff] }
  0x14   :  { %409 = vpow2.f32 %v388_v7  ;;  %v168_v18 = vmul.f32 1.442695, %v161_v17  ;;  %v173_v19 = vld [vmem:[#allocation7 + $0x18] sm:$0xf]  ;;  %v179_v21 = vrot.slane %v170_v11, 4  ;;  %v181_v22 = vrot.slane %v172_v16, 4 }
  0x15   :  { %411 = vpow2.f32 %v162_v10  ;;  %v389_v23 = vmul.f32 -1.442695, %v197_v20  ;;  %v180_v25 = vrot.slane %v171_v14, 4  ;;  %v183_v26 = vrot.slane %v173_v19, 4  ;;  %v198_v27 = vld [vmem:[#allocation2 + $0x38] sm:$0xff]  ;;  %v199_v28 = vld [vmem:[#allocation2 + $0x40] sm:$0xff] }
  0x16   :  { %413 = vpow2.f32 %v164_v12  ;;  %v182_v34 = vsel %vm178_vm0, %v179_v21, %v181_v22  ;;  %v390_v35 = vmul.f32 -1.442695, %v198_v27  ;;  %v391_v36 = vmul.f32 -1.442695, %v199_v28  ;;  %v200_v37 = vld [vmem:[#allocation2 + $0x48] sm:$0xff]  ;;  %v201_v38 = vld [vmem:[#allocation2 + $0x50] sm:$0xff] }
  0x17   :  { %v404_v24 = vpop.eup %403  ;;  %415 = vpow2.f32 %v166_v15  ;;  %v184_v42 = vsel %vm178_vm0, %v180_v25, %v183_v26  ;;  %v202_v43 = vld [vmem:[#allocation2 + $0x58] sm:$0xff]  ;;  %v392_v52 = vmul.f32 -1.442695, %v200_v37  ;;  %v393_v53 = vmul.f32 -1.442695, %v201_v38  ;;  %s371_s30 = sshll.u32 %s808_s3, 4  ;;  %s372_s30 = int_to_ptr.hbm [resolvable:$true] %s371_s30 }
  0x18   :  { %v406_v29 = vpop.eup %405  ;;  %v605_v30 = vadd.f32 1.0, %v404_v24  ;;  %417 = vpow2.f32 %v168_v18  ;;  %v624_v55 = vmul.f32 -1.442695, %v202_v43 }
  0x19   :  { %v408_v31 = vpop.eup %407  ;;  %v607_v32 = vadd.f32 1.0, %v406_v29  ;;  %419 = vpow2.f32 %v389_v23 }
  0x1a   :  { %v410_v33 = vpop.eup %409  ;;  %421 = vrcp.f32 %v605_v30  ;;  %v91_v40 = vand.u32 2147483647, %v605_v30  ;;  %v93_v41 = vand.u32 2147483648, %v605_v30  ;;  %v617_v47 = vadd.f32 1.0, %v408_v31 }
  0x1b   :  { %v412_v39 = vpop.eup %411  ;;  %423 = vrcp.f32 %v607_v32  ;;  %v106_v45 = vand.u32 2147483647, %v607_v32  ;;  %v108_v46 = vand.u32 2147483648, %v607_v32  ;;  %v619_v48 = vadd.f32 1.0, %v410_v33 }
  0x1c   :  { %v414_v44 = vpop.eup %413  ;;  %v189_v50 = vmul.f32 %v412_v39, %v179_v21  ;;  %vm87_vm1 = vweird.f32 %v605_v30  ;;  %vm102_vm2 = vweird.f32 %v607_v32  ;;  %425 = vrcp.f32 %v617_v47 }
  0x1d   :  { %v416_v49 = vpop.eup %415  ;;  %v190_v51 = vmul.f32 %v414_v44, %v180_v25  ;;  %vm626_vm3 = vcmp.eq.f32.partialorder %v91_v40, 8.507059e+37  ;;  %v94_v58 = vor.u32 1.1754944e-38, %v93_v41  ;;  %v121_v59 = vand.u32 2147483647, %v617_v47  ;;  %v147_v41 = vld [vmem:[#allocation5 + $0x8] sm:$0xff] }
  0x1e   :  { %v418_v54 = vpop.eup %417  ;;  %427 = vrcp.f32 %v619_v48  ;;  %193 = vst [vmem:[#allocation8 + $0x10] sm:$0xf0] %v189_v50  ;;  %vm632_vm4 = vcmp.eq.f32.partialorder %v106_v45, 8.507059e+37  ;;  %v109_v62 = vor.u32 1.1754944e-38, %v108_v46  ;;  %v123_v63 = vand.u32 2147483648, %v617_v47 }
  0x1f   :  { %v420_v56 = vpop.eup %419  ;;  %194 = vst [vmem:[#allocation8 + $0x18] sm:$0xf0] %v190_v51  ;;  %v191_v0 = vmul.f32 %v416_v49, %v182_v34  ;;  %v192_v1 = vmul.f32 %v418_v54, %v184_v42  ;;  %vm117_vm5 = vweird.f32 %v617_v47  ;;  %v136_v4 = vand.u32 2147483647, %v619_v48  ;;  %v148_v54 = vld [vmem:[#allocation5 + $0x10] sm:$0xf] }
  0x20   :  { %v422_v60 = vpop.eup %421  ;;  %v138_v5 = vand.u32 2147483648, %v619_v48  ;;  %vm132_vm6 = vweird.f32 %v619_v48  ;;  %v643_v7 = vadd.f32 1.0, %v420_v56  ;;  %429 = vpow2.f32 %v390_v35  ;;  %v146_v35 = vld [vmem:[#allocation5] sm:$0xff] }
  0x21   :  { %v424_v2 = vpop.eup %423  ;;  %v83_v3 = vmul.f32 %v422_v60, %v605_v30  ;;  %195 = vst [vmem:[#allocation8 + $0x20] sm:$0xff] %v191_v0  ;;  %vm88_vm7 = vweird.f32 %v422_v60  ;;  %vm645_vm8 = vcmp.eq.f32.partialorder %v121_v59, 8.507059e+37  ;;  %431 = vpow2.f32 %v391_v36  ;;  %v149_v59 = vld [vmem:[#allocation5 + $0x18] sm:$0xf] }
  0x22   :  { %v98_v6 = vmul.f32 %v424_v2, %v607_v32  ;;  %196 = vst [vmem:[#allocation8 + $0x28] sm:$0xff] %v192_v1  ;;  %v426_v10 = vpop.eup %425  ;;  %vm103_vm9 = vweird.f32 %v424_v2  ;;  %v124_v12 = vor.u32 1.1754944e-38, %v123_v63  ;;  %433 = vrcp.f32 %v643_v7  ;;  %vm657_vm11 = vmor %vm87_vm1, %vm88_vm7 }
  0x23   :  { %v84_v8 = vsub.f32 1.0, %v83_v3  ;;  %v113_v15 = vmul.f32 %v426_v10, %v617_v47  ;;  %vm651_vm10 = vcmp.eq.f32.partialorder %v136_v4, 8.507059e+37  ;;  %v139_v17 = vor.u32 1.1754944e-38, %v138_v5  ;;  %vm666_vm13 = vmor %vm102_vm2, %vm103_vm9 }
  0x24   :  { %v99_v11 = vsub.f32 1.0, %v98_v6  ;;  %v428_v13 = vpop.eup %427  ;;  %vm242_vm12 = vweird.f32 %v643_v7  ;;  %v246_v21 = vand.u32 2147483647, %v643_v7  ;;  %vm118_vm14 = vweird.f32 %v426_v10 }
  0x25   :  { %v85_v14 = vmul.f32 %v422_v60, %v84_v8  ;;  %v128_v20 = vmul.f32 %v428_v13, %v619_v48  ;;  %v114_v24 = vsub.f32 1.0, %v113_v15  ;;  %v248_v25 = vand.u32 2147483648, %v643_v7  ;;  %vm682_vm0 = vmor %vm117_vm5, %vm118_vm14  ;;  %v203_v8 = vld [vmem:[#allocation2 + $0x60] sm:$0x3f] }
  0x26   :  { %v100_v19 = vmul.f32 %v424_v2, %v99_v11  ;;  %v430_v26 = vpop.eup %429  ;;  %vm133_vm15 = vweird.f32 %v428_v13  ;;  %435 = vpow2.f32 %v392_v52  ;;  %v204_v11 = vld [vmem:[#allocation2 + $0x68] sm:$0x3f] }
  0x27   :  { %v86_v22 = vadd.f32 %v422_v60, %v85_v14  ;;  %v129_v28 = vsub.f32 1.0, %v128_v20  ;;  %v432_v29 = vpop.eup %431  ;;  %v115_v31 = vmul.f32 %v426_v10, %v114_v24  ;;  %v673_v33 = vadd.f32 1.0, %v430_v26  ;;  %vm692_vm1 = vmor %vm132_vm6, %vm133_vm15 }
  0x28   :  { %v101_v27 = vadd.f32 %v424_v2, %v100_v19  ;;  %437 = vpow2.f32 %v393_v53  ;;  %v434_v32 = vpop.eup %433  ;;  %v698_v47 = vadd.f32 1.0, %v432_v29  ;;  %v249_v0 = vor.u32 1.1754944e-38, %v248_v25 }
  0x29   :  { %v90_v30 = vsel %vm657_vm11, %v422_v60, %v86_v22  ;;  %v130_v38 = vmul.f32 %v428_v13, %v129_v28  ;;  %439 = vpow2.f32 %v624_v55  ;;  %v116_v42 = vadd.f32 %v426_v10, %v115_v31 }
  0x2a   :  { %v95_v34 = vsel %vm626_vm3, %v94_v58, %v90_v30  ;;  %v105_v36 = vsel %vm666_vm13, %v424_v2, %v101_v27  ;;  %v238_v44 = vmul.f32 %v434_v32, %v643_v7  ;;  %441 = vrcp.f32 %v673_v33 }
  0x2b   :  { %v142_v39 = vmul.f32 16.0, %v95_v34  ;;  %v110_v40 = vsel %vm632_vm4, %v109_v62, %v105_v36  ;;  %v131_v46 = vadd.f32 %v428_v13, %v130_v38  ;;  %v120_v50 = vsel %vm682_vm0, %v426_v10, %v116_v42 }
  0x2c   :  { %v143_v45 = vmul.f32 16.0, %v110_v40  ;;  %v239_v51 = vsub.f32 1.0, %v238_v44  ;;  %vm243_vm2 = vweird.f32 %v434_v32  ;;  %v436_v52 = vpop.eup %435  ;;  %v125_v53 = vsel %vm645_vm8, %v124_v12, %v120_v50 }
  0x2d   :  { %v150_v49 = vadd.f32 %v146_v35, %v142_v39  ;;  %v135_v55 = vsel %vm692_vm1, %v428_v13, %v131_v46  ;;  %v144_v57 = vmul.f32 16.0, %v125_v53  ;;  %vm711_vm3 = vmor %vm242_vm12, %vm243_vm2  ;;  %443 = vrcp.f32 %v698_v47 }
  0x2e   :  { %v151_v48 = vadd.f32 %v147_v41, %v143_v45  ;;  %v438_v56 = vpop.eup %437  ;;  %v140_v58 = vsel %vm651_vm10, %v139_v17, %v135_v55  ;;  %v240_v60 = vmul.f32 %v434_v32, %v239_v51  ;;  %vm247_vm4 = vcmp.eq.f32.partialorder %v246_v21, 8.507059e+37 }
  0x2f   :  { %154 = vst [vmem:[#allocation8] sm:$0xff] %v150_v49  ;;  %v440_v61 = vpop.eup %439  ;;  %v145_v62 = vmul.f32 16.0, %v140_v58  ;;  %v152_v1 = vadd.f32 %v148_v54, %v144_v57  ;;  %v716_v5 = vadd.f32 1.0, %v436_v52  ;;  %v718_v6 = vadd.f32 1.0, %v438_v56 }
  0x30   :  { %155 = vst [vmem:[#allocation8 + $0x8] sm:$0xff] %v151_v48  ;;  %v241_v2 = vadd.f32 %v434_v32, %v240_v60  ;;  %v442_v3 = vpop.eup %441  ;;  %vm257_vm5 = vweird.f32 %v673_v33  ;;  %v261_v10 = vand.u32 2147483647, %v673_v33  ;;  %v263_v13 = vand.u32 2147483648, %v673_v33 }
  0x31   :  { %v153_v4 = vadd.f32 %v149_v59, %v145_v62  ;;  %156 = vst [vmem:[#allocation8 + $0x10] sm:$0xf] %v152_v1  ;;  %v253_v9 = vmul.f32 %v442_v3, %v673_v33  ;;  %v276_v14 = vand.u32 2147483647, %v698_v47  ;;  %445 = vrcp.f32 %v716_v5 }
  0x32   :  { %v245_v7 = vsel %vm711_vm3, %v434_v32, %v241_v2  ;;  %vm258_vm6 = vweird.f32 %v442_v3  ;;  %v278_v16 = vand.u32 2147483648, %v698_v47  ;;  %447 = vrcp.f32 %v718_v6 }
  0x33   :  { %157 = vst [vmem:[#allocation8 + $0x18] sm:$0xf] %v153_v4  ;;  %v250_v12 = vsel %vm247_vm4, %v249_v0, %v245_v7  ;;  %v254_v15 = vsub.f32 1.0, %v253_v9  ;;  %v444_v17 = vpop.eup %443  ;;  %v730_v18 = vadd.f32 1.0, %v440_v61  ;;  %v395_v19 = vmul.f32 -1.442695, %v203_v8  ;;  %vm740_vm9 = vmor %vm257_vm5, %vm258_vm6 }
  0x34   :  { %357 = vst [vmem:[#allocation8 + $0x30] sm:$0xff] %v250_v12  ;;  %v396_v20 = vmul.f32 -1.442695, %v204_v11  ;;  %vm732_vm7 = vcmp.eq.f32.partialorder %v261_v10, 8.507059e+37  ;;  %v268_v23 = vmul.f32 %v444_v17, %v698_v47  ;;  %vm272_vm8 = vweird.f32 %v698_v47 }
  0x35   :  { %v255_v21 = vmul.f32 %v442_v3, %v254_v15  ;;  %v264_v25 = vor.u32 1.1754944e-38, %v263_v13  ;;  %vm744_vm10 = vcmp.eq.f32.partialorder %v276_v14, 8.507059e+37  ;;  %v291_v27 = vand.u32 2147483647, %v716_v5 }
  0x36   :  { %449 = vrcp.f32 %v730_v18  ;;  %v269_v29 = vsub.f32 1.0, %v268_v23  ;;  %vm273_vm11 = vweird.f32 %v444_v17  ;;  %v279_v30 = vor.u32 1.1754944e-38, %v278_v16 }
  0x37   :  { %v256_v28 = vadd.f32 %v442_v3, %v255_v21  ;;  %v446_v31 = vpop.eup %445  ;;  %vm287_vm12 = vweird.f32 %v716_v5  ;;  %v293_v33 = vand.u32 2147483648, %v716_v5  ;;  %v308_v32 = vand.u32 2147483648, %v718_v6  ;;  %vm761_vm14 = vmor %vm272_vm8, %vm273_vm11 }
  0x38   :  { %451 = vpow2.f32 %v395_v19  ;;  %v448_v34 = vpop.eup %447  ;;  %v270_v36 = vmul.f32 %v444_v17, %v269_v29  ;;  %v283_v37 = vmul.f32 %v446_v31, %v716_v5  ;;  %vm302_vm13 = vweird.f32 %v718_v6 }
  0x39   :  { %v260_v35 = vsel %vm740_vm9, %v442_v3, %v256_v28  ;;  %vm765_vm15 = vcmp.eq.f32.partialorder %v291_v27, 8.507059e+37  ;;  %v298_v41 = vmul.f32 %v448_v34, %v718_v6  ;;  %v306_v42 = vand.u32 2147483647, %v718_v6 }
  0x3a   :  { %v265_v38 = vsel %vm732_vm7, %v264_v25, %v260_v35  ;;  %v271_v43 = vadd.f32 %v444_v17, %v270_v36  ;;  %v284_v44 = vsub.f32 1.0, %v283_v37  ;;  %vm288_vm0 = vweird.f32 %v446_v31 }
  0x3b   :  { %358 = vst [vmem:[#allocation8 + $0x38] sm:$0xff] %v265_v38  ;;  %453 = vpow2.f32 %v396_v20  ;;  %v294_v46 = vor.u32 1.1754944e-38, %v293_v33  ;;  %v299_v47 = vsub.f32 1.0, %v298_v41  ;;  %vm303_vm1 = vweird.f32 %v448_v34  ;;  %vm779_vm3 = vmor %vm287_vm12, %vm288_vm0 }
  0x3c   :  { %v450_v45 = vpop.eup %449  ;;  %v309_v49 = vor.u32 1.1754944e-38, %v308_v32  ;;  %v275_v50 = vsel %vm761_vm14, %v444_v17, %v271_v43  ;;  %v285_v51 = vmul.f32 %v446_v31, %v284_v44  ;;  %vm317_vm2 = vweird.f32 %v730_v18  ;;  %vm787_vm4 = vmor %vm302_vm13, %vm303_vm1 }
  0x3d   :  { %v313_v52 = vmul.f32 %v450_v45, %v730_v18  ;;  %v280_v53 = vsel %vm744_vm10, %v279_v30, %v275_v50  ;;  %v300_v55 = vmul.f32 %v448_v34, %v299_v47  ;;  %v321_v56 = vand.u32 2147483647, %v730_v18 }
  0x3e   :  { %v452_v48 = vpop.eup %451  ;;  %v323_v57 = vand.u32 2147483648, %v730_v18  ;;  %359 = vst [vmem:[#allocation8 + $0x40] sm:$0xff] %v280_v53  ;;  %v286_v58 = vadd.f32 %v446_v31, %v285_v51  ;;  %vm318_vm5 = vweird.f32 %v450_v45  ;;  %vm307_vm6 = vcmp.eq.f32.partialorder %v306_v42, 8.507059e+37 }
  0x3f   :  { %v314_v60 = vsub.f32 1.0, %v313_v52  ;;  %v235_v61 = vadd.f32 1.0, %v452_v48  ;;  %v301_v62 = vadd.f32 %v448_v34, %v300_v55  ;;  %vm319_vm7 = vmor %vm317_vm2, %vm318_vm5  ;;  %vm322_vm8 = vcmp.eq.f32.partialorder %v321_v56, 8.507059e+37 }
  0x40   :  { %v290_v0 = vsel %vm779_vm3, %v446_v31, %v286_v58  ;;  %v324_v4 = vor.u32 1.1754944e-38, %v323_v57 }
  0x41   :  { %v454_v63 = vpop.eup %453  ;;  %v315_v1 = vmul.f32 %v450_v45, %v314_v60  ;;  %455 = vrcp.f32 %v235_v61  ;;  %v295_v2 = vsel %vm765_vm15, %v294_v46, %v290_v0  ;;  %v305_v3 = vsel %vm787_vm4, %v448_v34, %v301_v62 }
  0x42   :  { %360 = vst [vmem:[#allocation8 + $0x48] sm:$0xff] %v295_v2  ;;  %v310_v5 = vsel %vm307_vm6, %v309_v49, %v305_v3  ;;  %v236_v8 = vadd.f32 1.0, %v454_v63  ;;  %v336_v12 = vand.u32 2147483647, %v235_v61  ;;  %v338_v13 = vand.u32 2147483648, %v235_v61 }
  0x43   :  { %v316_v6 = vadd.f32 %v450_v45, %v315_v1  ;;  %361 = vst [vmem:[#allocation8 + $0x50] sm:$0xff] %v310_v5  ;;  %vm332_vm9 = vweird.f32 %v235_v61 }
  0x44   :  { %457 = vrcp.f32 %v236_v8  ;;  %vm337_vm12 = vcmp.eq.f32.partialorder %v336_v12, 8.507059e+37  ;;  %v339_v18 = vor.u32 1.1754944e-38, %v338_v13  ;;  %vm347_vm13 = vweird.f32 %v236_v8 }
  0x45   :  { %v320_v7 = vsel %vm319_vm7, %v450_v45, %v316_v6  ;;  %v353_v19 = vand.u32 2147483648, %v236_v8  ;;  %v351_v22 = vand.u32 2147483647, %v236_v8 }
  0x46   :  { %v325_v9 = vsel %vm322_vm8, %v324_v4, %v320_v7 }
  0x47   :  { %v456_v10 = vpop.eup %455  ;;  %362 = vst [vmem:[#allocation8 + $0x58] sm:$0xff] %v325_v9  ;;  %v354_v26 = vor.u32 1.1754944e-38, %v353_v19  ;;  %vm352_vm0 = vcmp.eq.f32.partialorder %v351_v22, 8.507059e+37 }
  0x48   :  { %v328_v11 = vmul.f32 %v456_v10, %v235_v61  ;;  %vm333_vm10 = vweird.f32 %v456_v10 }
  0x49   :  { %vm334_vm11 = vmor %vm332_vm9, %vm333_vm10 }
  0x4a   :  { %v329_v14 = vsub.f32 1.0, %v328_v11  ;;  %v458_v15 = vpop.eup %457 }
  0x4b   :  { %v343_v17 = vmul.f32 %v458_v15, %v236_v8  ;;  %vm348_vm14 = vweird.f32 %v458_v15 }
  0x4c   :  { %v330_v16 = vmul.f32 %v456_v10, %v329_v14  ;;  %vm349_vm15 = vmor %vm347_vm13, %vm348_vm14 }
  0x4d   :  { %v344_v21 = vsub.f32 1.0, %v343_v17 }
  0x4e   :  { %v331_v20 = vadd.f32 %v456_v10, %v330_v16 }
  0x4f   :  { %v345_v24 = vmul.f32 %v458_v15, %v344_v21 }
  0x50   :  { %v335_v23 = vsel %vm334_vm11, %v456_v10, %v331_v20 }
  0x51   :  { %v340_v25 = vsel %vm337_vm12, %v339_v18, %v335_v23  ;;  %v346_v27 = vadd.f32 %v458_v15, %v345_v24 }
  0x52   :  { %363 = vst [vmem:[#allocation8 + $0x60] sm:$0x3f] %v340_v25 }
  0x53   :  { %v350_v28 = vsel %vm349_vm15, %v458_v15, %v346_v27 }
  0x54   :  { %v355_v29 = vsel %vm352_vm0, %v354_v26, %v350_v28 }
  0x55   :  { %364 = vst [vmem:[#allocation8 + $0x68] sm:$0x3f] %v355_v29 }
  0x56   :  { %377 = dma.vmem_to_hbm [thread:$0]  %s370_s27, 1792, %s372_s30, [#allocation4], %s562_s20, %s562_s20, %s563_s21  }
  0x57   :  { %559 = dma.done.wait [#allocation4], 1792  }
  0x58   :  { %560 = vsyncadd [#allocation4], 4294965504 }
  0x59   :  { %382 = vsyncpa [#allocation3], 1 }
  0x5a   :  { %383 = vsyncpa [#allocation6], 1 }
  0x5b   :  { %384 = vsyncpa [#allocation4], 1 }

</bundles_post_ra>
